<compile_context>
chip_gen: v7x
topology: tpu7x:2x2x1
jax: 0.10.0
libtpu: 0.0.40
codegen_flags: <defaults>
</compile_context>

<pallas_src>
import functools

import jax
import jax.numpy as jnp
from jax.experimental import pallas as pl
from jax.experimental.pallas import tpu as pltpu


# ----------------------------------------------------------------------------
# Kernel
# ----------------------------------------------------------------------------
def attention_kernel(x_ref, gamma_ref, beta_ref, wqkv_ref, wout_ref, bout_ref,
                     o_ref, ctx_ref, *, heads, dim_head, eps):
    """Fused attention for one batch tile (grid iterates over batch tiles)."""
    bt, n, d = x_ref.shape
    rows = bt * n
    inner = heads * dim_head

    # ---- LayerNorm over the last dim (f32 stats, nn.LayerNorm semantics) ----
    x = x_ref[...].reshape(rows, d).astype(jnp.float32)
    mean = jnp.mean(x, axis=-1, keepdims=True)
    var = jnp.mean((x - mean) ** 2, axis=-1, keepdims=True)
    x_ln = (x - mean) * jax.lax.rsqrt(var + eps)
    x_ln = x_ln * gamma_ref[0].astype(jnp.float32) + beta_ref[0].astype(jnp.float32)

    # ---- QKV projection: bf16 operands, f32 accumulation on the MXU ----
    # (softmax scale was pre-folded into the Q columns of W_qkv.)
    qkv = jnp.dot(x_ln.astype(jnp.bfloat16), wqkv_ref[...],
                  preferred_element_type=jnp.float32)          # (rows, 3*inner)

    # ---- Multi-head attention, batched over the batch tile per head ----
    # Static loop keeps head slices at static lane offsets; each head's context
    # goes straight into the bf16 scratch so the output projection below is a
    # single K=inner matmul.
    for h in range(heads):
        lo = h * dim_head
        qh = qkv[:, lo:lo + dim_head].reshape(bt, n, dim_head)
        kh = qkv[:, inner + lo:inner + lo + dim_head].reshape(bt, n, dim_head)
        vh = qkv[:, 2 * inner + lo:2 * inner + lo + dim_head].reshape(bt, n, dim_head)

        # Contract dim_head of both operands directly (no explicit transpose).
        dots = jnp.einsum('bqd,bkd->bqk',
                          qh.astype(jnp.bfloat16), kh.astype(jnp.bfloat16),
                          preferred_element_type=jnp.float32)   # (bt, n, n)
        # Softmax in f32; normalization deferred past the PV matmul
        # (normalizes n*dim_head elements instead of n*n).
        dots = dots - jnp.max(dots, axis=-1, keepdims=True)
        p = jnp.exp(dots)
        denom = jnp.sum(p, axis=-1, keepdims=True)
        ctx = jnp.einsum('bqk,bkd->bqd',
                         p.astype(jnp.bfloat16), vh.astype(jnp.bfloat16),
                         preferred_element_type=jnp.float32)    # (bt, n, dh)
        ctx = ctx * pl.reciprocal(denom, approx=True)           # EUP slot
        # dropout(p=0.0) is identity.

        ctx_ref[:, lo:lo + dim_head] = (
            ctx.reshape(rows, dim_head).astype(jnp.bfloat16))

    # ---- Output projection: one dense (rows, inner) x (inner, D) matmul ----
    y = jnp.dot(ctx_ref[...], wout_ref[...],
                preferred_element_type=jnp.float32)
    y = y + bout_ref[0].astype(jnp.float32)
    o_ref[...] = y.reshape(bt, n, d).astype(o_ref.dtype)


# ----------------------------------------------------------------------------
# Tiling / VMEM budgeting helpers
# ----------------------------------------------------------------------------
def _round_up(v, m):
    return ((v + m - 1) // m) * m


def _vmem_capacity_bytes():
    """Physical VMEM per core; conservative 64 MiB fallback (v7x per-TC)."""
    try:
        info = pltpu.get_tpu_info()
        cap = getattr(info, "vmem_capacity_bytes", None)
        if cap:
            return int(cap)
    except Exception:
        pass
    return 64 * 1024 * 1024


def _tile_vmem_bytes(bt, N, D, heads, dim_head, x_itemsize):
    """Rough per-grid-step working-set estimate, padded to (8,128) tiles."""
    inner = heads * dim_head
    rows = bt * N
    sub = lambda r: _round_up(max(r, 1), 8)
    lane = lambda c: _round_up(max(c, 1), 128)
    b = 0
    # pipelined x / out tiles (double-buffered by BlockSpec)
    b += 2 * 2 * bt * sub(N) * lane(D) * x_itemsize
    # bf16 weights (double-buffered allocation, fetched once)
    b += 2 * (sub(D) * lane(3 * inner) + sub(inner) * lane(D)) * 2
    # f32 x_ln and fused qkv slabs
    b += sub(rows) * lane(D) * 4
    b += sub(rows) * lane(3 * inner) * 4
    # bf16 ctx scratch + one head's scores/probs + context in f32
    b += sub(rows) * lane(inner) * 2
    b += 2 * bt * sub(N) * lane(N) * 4
    b += bt * sub(N) * lane(dim_head) * 4
    return int(b * 1.3)   # slack for spills / compiler-internal scratch


def _choose_batch_block(B, N, D, heads, dim_head, x_itemsize, budget_bytes):
    """Largest batch tile that still gives >= 2-4 grid steps and fits VMEM."""
    divisors = [d for d in range(1, B + 1) if B % d == 0]
    fitting = [d for d in divisors
               if _tile_vmem_bytes(d, N, D, heads, dim_head, x_itemsize)
               <= budget_bytes]
    if not fitting:
        return 1
    target_blocks = 4 if B >= 4 else (2 if B >= 2 else 1)
    preferred = [d for d in fitting if B // d >= target_blocks]
    return max(preferred) if preferred else min(fitting)


# ----------------------------------------------------------------------------
# Parameter prep (one-time weight transform) + forward wrapper
# ----------------------------------------------------------------------------
def prepare_params(gamma, beta, w_qkv, w_out, b_out, *, heads, dim_head):
    """Fold the softmax scale into W_qkv's Q columns and cast weights to bf16."""
    inner = heads * dim_head
    scale = dim_head ** -0.5
    col_scale = jnp.concatenate([
        jnp.full((inner,), scale, dtype=w_qkv.dtype),
        jnp.ones((2 * inner,), dtype=w_qkv.dtype),
    ])
    w_qkv_p = (w_qkv * col_scale[None, :]).astype(jnp.bfloat16)
    w_out_p = w_out.astype(jnp.bfloat16)
    return gamma, beta, w_qkv_p, w_out_p, b_out


def attention_forward(x, gamma, beta, w_qkv_p, w_out_p, b_out, *, heads,
                      dim_head, eps=1e-5, batch_block=None):
    B, N, D = x.shape
    inner = heads * dim_head
    assert w_qkv_p.shape == (D, 3 * inner)
    assert w_out_p.shape == (inner, D)

    cap = _vmem_capacity_bytes()
    vmem_limit = max(32 * 1024 * 1024, int(cap * 0.85))   # ~54 MiB v7x, ~109 MiB v5e/v6e
    ws_budget = int(cap * 0.60)

    if batch_block is None:
        batch_block = _choose_batch_block(B, N, D, heads, dim_head,
                                          x.dtype.itemsize, ws_budget)
    assert B % batch_block == 0, "batch must divide evenly into batch tiles"
    num_blocks = B // batch_block
    rows = batch_block * N

    kernel = functools.partial(attention_kernel, heads=heads,
                               dim_head=dim_head, eps=eps)

    # Advisory cost estimate so XLA schedules the custom call sensibly.
    flops = 2 * B * N * (D * 3 * inner + 2 * heads * N * dim_head + inner * D)
    bytes_accessed = (2 * x.size * x.dtype.itemsize
                      + 2 * (w_qkv_p.size + w_out_p.size)
                      + 4 * (gamma.size + beta.size + b_out.size))
    cost = pl.CostEstimate(flops=flops,
                           transcendentals=B * heads * N * N,
                           bytes_accessed=bytes_accessed)

    return pl.pallas_call(
        kernel,
        out_shape=jax.ShapeDtypeStruct((B, N, D), x.dtype),
        grid_spec=pltpu.PrefetchScalarGridSpec(
            num_scalar_prefetch=0,
            grid=(num_blocks,),
            in_specs=[
                pl.BlockSpec((batch_block, N, D), lambda b: (b, 0, 0)),   # x
                pl.BlockSpec((1, D), lambda b: (0, 0)),                   # LN gamma
                pl.BlockSpec((1, D), lambda b: (0, 0)),                   # LN beta
                pl.BlockSpec((D, 3 * inner), lambda b: (0, 0)),           # W_qkv (bf16, scale-folded)
                pl.BlockSpec((inner, D), lambda b: (0, 0)),               # W_out (bf16)
                pl.BlockSpec((1, D), lambda b: (0, 0)),                   # b_out
            ],
            out_specs=pl.BlockSpec((batch_block, N, D), lambda b: (b, 0, 0)),
            scratch_shapes=[pltpu.VMEM((rows, inner), jnp.bfloat16)],     # ctx slab
        ),
        compiler_params=pltpu.CompilerParams(
            dimension_semantics=("parallel",),
            vmem_limit_bytes=vmem_limit),
        cost_estimate=cost,
    )(x, gamma, beta, w_qkv_p, w_out_p, b_out)


# ----------------------------------------------------------------------------
# Pure-JAX reference (f32) mirroring the PyTorch forward
# ----------------------------------------------------------------------------
def attention_reference(x, gamma, beta, w_qkv, w_out, b_out, *, heads,
                        dim_head, eps=1e-5):
    B, N, D = x.shape
    inner = heads * dim_head
    scale = dim_head ** -0.5
    mean = jnp.mean(x, axis=-1, keepdims=True)
    var = jnp.mean((x - mean) ** 2, axis=-1, keepdims=True)
    x_ln = (x - mean) / jnp.sqrt(var + eps) * gamma[0] + beta[0]
    qkv = x_ln @ w_qkv
    q, k, v = jnp.split(qkv, 3, axis=-1)

    def to_heads(t):
        return t.reshape(B, N, heads, dim_head).transpose(0, 2, 1, 3)

    q, k, v = map(to_heads, (q, k, v))
    dots = jnp.einsum('bhqd,bhkd->bhqk', q, k) * scale
    attn = jax.nn.softmax(dots, axis=-1)
    out = jnp.einsum('bhqk,bhkd->bhqd', attn, v)
    out = out.transpose(0, 2, 1, 3).reshape(B, N, inner)
    return out @ w_out + b_out[0]


if __name__ == "__main__":
    # Small shapes consistent with the module: dim=32, heads=4, dim_head=16
    B, N, D = 2, 8, 32
    heads, dim_head = 4, 16
    inner = heads * dim_head  # 64 -> project_out=True

    key = jax.random.PRNGKey(0)
    kx, kqkv, kout, kbout = jax.random.split(key, 4)

    x = jax.random.normal(kx, (B, N, D), dtype=jnp.float32)
    gamma = jnp.ones((1, D), dtype=jnp.float32)            # LayerNorm weight
    beta = jnp.zeros((1, D), dtype=jnp.float32)            # LayerNorm bias
    w_qkv = jax.random.normal(kqkv, (D, 3 * inner), dtype=jnp.float32) * 0.05
    w_out = jax.random.normal(kout, (inner, D), dtype=jnp.float32) * 0.05
    b_out = jax.random.normal(kbout, (1, D), dtype=jnp.float32) * 0.05

    # One-time parameter transform (scale fold + bf16 cast).
    g_p, b_p, w_qkv_p, w_out_p, bout_p = prepare_params(
        gamma, beta, w_qkv, w_out, b_out, heads=heads, dim_head=dim_head)

    y = attention_forward(x, g_p, b_p, w_qkv_p, w_out_p, bout_p,
                          heads=heads, dim_head=dim_head)
    y = jax.block_until_ready(y)

    y_ref = attention_reference(x, gamma, beta, w_qkv, w_out, b_out,
                                heads=heads, dim_head=dim_head)
    # Tolerance accounts for bf16 MXU operands (~0.4% rel per matmul, f32
    # accumulation) plus the approx (EUP) reciprocal in the softmax denom.
    assert jnp.allclose(y, y_ref, atol=1e-2, rtol=1e-2), "mismatch vs reference"

    print("KERNEL_OK")
</pallas_src>

<mosaic_0001>
module attributes {stable_mosaic.version = 11 : i64} {
  func.func @attention_kernel(%arg0: i32, %arg1: memref<1x8x32xf32, #tpu.memory_space<vmem>>, %arg2: memref<1x32xf32, #tpu.memory_space<vmem>>, %arg3: memref<1x32xf32, #tpu.memory_space<vmem>>, %arg4: memref<32x192xbf16, #tpu.memory_space<vmem>>, %arg5: memref<64x32xbf16, #tpu.memory_space<vmem>>, %arg6: memref<1x32xf32, #tpu.memory_space<vmem>>, %arg7: memref<1x8x32xf32, #tpu.memory_space<vmem>>, %arg8: memref<8x64xbf16, #tpu.memory_space<vmem>>) attributes {dimension_semantics = [#tpu.dimension_semantics<parallel>], iteration_bounds = array<i64: 2>, scalar_prefetch = 0 : i64, scratch_operands = 1 : i64, tpu.core_type = #tpu.core_type<tc>, window_params = [{transform_indices = @transform_0, window_bounds = array<i64: 1, 8, 32>}, {pipeline_mode = #tpu.pipeline_mode<synchronous>, transform_indices = @transform_1, window_bounds = array<i64: 1, 32>}, {pipeline_mode = #tpu.pipeline_mode<synchronous>, transform_indices = @transform_2, window_bounds = array<i64: 1, 32>}, {pipeline_mode = #tpu.pipeline_mode<synchronous>, transform_indices = @transform_3, window_bounds = array<i64: 32, 192>}, {pipeline_mode = #tpu.pipeline_mode<synchronous>, transform_indices = @transform_4, window_bounds = array<i64: 64, 32>}, {pipeline_mode = #tpu.pipeline_mode<synchronous>, transform_indices = @transform_5, window_bounds = array<i64: 1, 32>}, {transform_indices = @transform_6, window_bounds = array<i64: 1, 8, 32>}]} {
    %c0 = arith.constant 0 : index
    %c0_0 = arith.constant 0 : index
    %c0_1 = arith.constant 0 : index
    %0 = vector.load %arg1[%c0, %c0_0, %c0_1] : memref<1x8x32xf32, #tpu.memory_space<vmem>>, vector<1x8x32xf32>
    %1 = vector.shape_cast %0 : vector<1x8x32xf32> to vector<8x32xf32>
    %cst = arith.constant dense<0.000000e+00> : vector<8xf32>
    %2 = vector.multi_reduction <add>, %1, %cst [1] : vector<8x32xf32> to vector<8xf32>
    %3 = vector.shape_cast %2 : vector<8xf32> to vector<8x1xf32>
    %cst_2 = arith.constant 3.200000e+01 : f32
    %4 = vector.broadcast %cst_2 : f32 to vector<8x1xf32>
    %5 = arith.divf %3, %4 : vector<8x1xf32>
    %6 = vector.broadcast %5 : vector<8x1xf32> to vector<8x32xf32>
    %7 = arith.subf %1, %6 : vector<8x32xf32>
    %8 = arith.mulf %7, %7 : vector<8x32xf32>
    %cst_3 = arith.constant dense<0.000000e+00> : vector<8xf32>
    %9 = vector.multi_reduction <add>, %8, %cst_3 [1] : vector<8x32xf32> to vector<8xf32>
    %10 = vector.shape_cast %9 : vector<8xf32> to vector<8x1xf32>
    %cst_4 = arith.constant 3.200000e+01 : f32
    %11 = vector.broadcast %cst_4 : f32 to vector<8x1xf32>
    %12 = arith.divf %10, %11 : vector<8x1xf32>
    %13 = vector.broadcast %5 : vector<8x1xf32> to vector<8x32xf32>
    %14 = arith.subf %1, %13 : vector<8x32xf32>
    %cst_5 = arith.constant 9.99999974E-6 : f32
    %15 = vector.broadcast %cst_5 : f32 to vector<8x1xf32>
    %16 = arith.addf %12, %15 : vector<8x1xf32>
    %17 = math.rsqrt %16 : vector<8x1xf32>
    %18 = vector.broadcast %17 : vector<8x1xf32> to vector<8x32xf32>
    %19 = arith.mulf %14, %18 : vector<8x32xf32>
    %c0_6 = arith.constant 0 : index
    %c0_7 = arith.constant 0 : index
    %20 = vector.load %arg2[%c0_6, %c0_7] : memref<1x32xf32, #tpu.memory_space<vmem>>, vector<1x32xf32>
    %21 = vector.shape_cast %20 : vector<1x32xf32> to vector<32xf32>
    %22 = vector.shape_cast %21 : vector<32xf32> to vector<1x32xf32>
    %23 = vector.broadcast %22 : vector<1x32xf32> to vector<8x32xf32>
    %24 = arith.mulf %19, %23 : vector<8x32xf32>
    %c0_8 = arith.constant 0 : index
    %c0_9 = arith.constant 0 : index
    %25 = vector.load %arg3[%c0_8, %c0_9] : memref<1x32xf32, #tpu.memory_space<vmem>>, vector<1x32xf32>
    %26 = vector.shape_cast %25 : vector<1x32xf32> to vector<32xf32>
    %27 = vector.shape_cast %26 : vector<32xf32> to vector<1x32xf32>
    %28 = vector.broadcast %27 : vector<1x32xf32> to vector<8x32xf32>
    %29 = arith.addf %24, %28 : vector<8x32xf32>
    %30 = arith.truncf %29 : vector<8x32xf32> to vector<8x32xbf16>
    %c0_10 = arith.constant 0 : index
    %c0_11 = arith.constant 0 : index
    %31 = vector.load %arg4[%c0_10, %c0_11] : memref<32x192xbf16, #tpu.memory_space<vmem>>, vector<32x192xbf16>
    %cst_12 = arith.constant dense<0.000000e+00> : vector<8x192xf32>
    %32 = tpu.matmul %30, %31, %cst_12 {dimension_numbers = #tpu.dot_dimension_numbers<[1], [0], [0], [1], [0, 0, 1, 1], [], []>} : vector<8x32xbf16>, vector<32x192xbf16>, vector<8x192xf32> -> vector<8x192xf32>
    %33 = vector.extract_strided_slice %32 {offsets = [0, 0], sizes = [8, 16], strides = [1, 1]} : vector<8x192xf32> to vector<8x16xf32>
    %34 = vector.shape_cast %33 : vector<8x16xf32> to vector<1x8x16xf32>
    %35 = vector.extract_strided_slice %32 {offsets = [0, 64], sizes = [8, 16], strides = [1, 1]} : vector<8x192xf32> to vector<8x16xf32>
    %36 = vector.shape_cast %35 : vector<8x16xf32> to vector<1x8x16xf32>
    %37 = vector.extract_strided_slice %32 {offsets = [0, 128], sizes = [8, 16], strides = [1, 1]} : vector<8x192xf32> to vector<8x16xf32>
    %38 = vector.shape_cast %37 : vector<8x16xf32> to vector<1x8x16xf32>
    %39 = arith.truncf %34 : vector<1x8x16xf32> to vector<1x8x16xbf16>
    %40 = arith.truncf %36 : vector<1x8x16xf32> to vector<1x8x16xbf16>
    "tpu.trace_start"() <{level = 10 : i32, message = "bqd,bkd->bqk"}> : () -> ()
    %cst_13 = arith.constant dense<0.000000e+00> : vector<1x8x8xf32>
    %41 = tpu.matmul %39, %40, %cst_13 {dimension_numbers = #tpu.dot_dimension_numbers<[2], [2], [1], [1], [0, 0, 0, 1, 1, 1], [0], [0]>} : vector<1x8x16xbf16>, vector<1x8x16xbf16>, vector<1x8x8xf32> -> vector<1x8x8xf32>
    "tpu.trace_stop"() : () -> ()
    %cst_14 = arith.constant dense<0xFF800000> : vector<1x8xf32>
    %42 = vector.multi_reduction <maximumf>, %41, %cst_14 [2] : vector<1x8x8xf32> to vector<1x8xf32>
    %43 = vector.shape_cast %42 : vector<1x8xf32> to vector<1x8x1xf32>
    %44 = vector.broadcast %43 : vector<1x8x1xf32> to vector<1x8x8xf32>
    %45 = arith.subf %41, %44 : vector<1x8x8xf32>
    %46 = math.exp %45 : vector<1x8x8xf32>
    %cst_15 = arith.constant dense<0.000000e+00> : vector<1x8xf32>
    %47 = vector.multi_reduction <add>, %46, %cst_15 [2] : vector<1x8x8xf32> to vector<1x8xf32>
    %48 = vector.shape_cast %47 : vector<1x8xf32> to vector<1x8x1xf32>
    %49 = arith.truncf %46 : vector<1x8x8xf32> to vector<1x8x8xbf16>
    %50 = arith.truncf %38 : vector<1x8x16xf32> to vector<1x8x16xbf16>
    "tpu.trace_start"() <{level = 10 : i32, message = "bqk,bkd->bqd"}> : () -> ()
    %cst_16 = arith.constant dense<0.000000e+00> : vector<1x8x16xf32>
    %51 = tpu.matmul %49, %50, %cst_16 {dimension_numbers = #tpu.dot_dimension_numbers<[2], [1], [1], [2], [0, 0, 0, 1, 1, 2], [0], [0]>} : vector<1x8x8xbf16>, vector<1x8x16xbf16>, vector<1x8x16xf32> -> vector<1x8x16xf32>
    "tpu.trace_stop"() : () -> ()
    %52 = tpu.reciprocal %48 {approx = true} : vector<1x8x1xf32> -> vector<1x8x1xf32>
    %53 = vector.broadcast %52 : vector<1x8x1xf32> to vector<1x8x16xf32>
    %54 = arith.mulf %51, %53 : vector<1x8x16xf32>
    %55 = vector.shape_cast %54 : vector<1x8x16xf32> to vector<8x16xf32>
    %56 = arith.truncf %55 : vector<8x16xf32> to vector<8x16xbf16>
    %c0_17 = arith.constant 0 : index
    %c0_18 = arith.constant 0 : index
    %57 = vector.load %arg8[%c0_17, %c0_18] : memref<8x64xbf16, #tpu.memory_space<vmem>>, vector<8x16xbf16>
    tpu.vector_store %arg8[%c0_17, %c0_18], %56 {strides = array<i32>} : memref<8x64xbf16, #tpu.memory_space<vmem>>, vector<8x16xbf16>,
    %58 = vector.extract_strided_slice %32 {offsets = [0, 16], sizes = [8, 16], strides = [1, 1]} : vector<8x192xf32> to vector<8x16xf32>
    %59 = vector.shape_cast %58 : vector<8x16xf32> to vector<1x8x16xf32>
    %60 = vector.extract_strided_slice %32 {offsets = [0, 80], sizes = [8, 16], strides = [1, 1]} : vector<8x192xf32> to vector<8x16xf32>
    %61 = vector.shape_cast %60 : vector<8x16xf32> to vector<1x8x16xf32>
    %62 = vector.extract_strided_slice %32 {offsets = [0, 144], sizes = [8, 16], strides = [1, 1]} : vector<8x192xf32> to vector<8x16xf32>
    %63 = vector.shape_cast %62 : vector<8x16xf32> to vector<1x8x16xf32>
    %64 = arith.truncf %59 : vector<1x8x16xf32> to vector<1x8x16xbf16>
    %65 = arith.truncf %61 : vector<1x8x16xf32> to vector<1x8x16xbf16>
    "tpu.trace_start"() <{level = 10 : i32, message = "bqd,bkd->bqk"}> : () -> ()
    %cst_19 = arith.constant dense<0.000000e+00> : vector<1x8x8xf32>
    %66 = tpu.matmul %64, %65, %cst_19 {dimension_numbers = #tpu.dot_dimension_numbers<[2], [2], [1], [1], [0, 0, 0, 1, 1, 1], [0], [0]>} : vector<1x8x16xbf16>, vector<1x8x16xbf16>, vector<1x8x8xf32> -> vector<1x8x8xf32>
    "tpu.trace_stop"() : () -> ()
    %cst_20 = arith.constant dense<0xFF800000> : vector<1x8xf32>
    %67 = vector.multi_reduction <maximumf>, %66, %cst_20 [2] : vector<1x8x8xf32> to vector<1x8xf32>
    %68 = vector.shape_cast %67 : vector<1x8xf32> to vector<1x8x1xf32>
    %69 = vector.broadcast %68 : vector<1x8x1xf32> to vector<1x8x8xf32>
    %70 = arith.subf %66, %69 : vector<1x8x8xf32>
    %71 = math.exp %70 : vector<1x8x8xf32>
    %cst_21 = arith.constant dense<0.000000e+00> : vector<1x8xf32>
    %72 = vector.multi_reduction <add>, %71, %cst_21 [2] : vector<1x8x8xf32> to vector<1x8xf32>
    %73 = vector.shape_cast %72 : vector<1x8xf32> to vector<1x8x1xf32>
    %74 = arith.truncf %71 : vector<1x8x8xf32> to vector<1x8x8xbf16>
    %75 = arith.truncf %63 : vector<1x8x16xf32> to vector<1x8x16xbf16>
    "tpu.trace_start"() <{level = 10 : i32, message = "bqk,bkd->bqd"}> : () -> ()
    %cst_22 = arith.constant dense<0.000000e+00> : vector<1x8x16xf32>
    %76 = tpu.matmul %74, %75, %cst_22 {dimension_numbers = #tpu.dot_dimension_numbers<[2], [1], [1], [2], [0, 0, 0, 1, 1, 2], [0], [0]>} : vector<1x8x8xbf16>, vector<1x8x16xbf16>, vector<1x8x16xf32> -> vector<1x8x16xf32>
    "tpu.trace_stop"() : () -> ()
    %77 = tpu.reciprocal %73 {approx = true} : vector<1x8x1xf32> -> vector<1x8x1xf32>
    %78 = vector.broadcast %77 : vector<1x8x1xf32> to vector<1x8x16xf32>
    %79 = arith.mulf %76, %78 : vector<1x8x16xf32>
    %80 = vector.shape_cast %79 : vector<1x8x16xf32> to vector<8x16xf32>
    %81 = arith.truncf %80 : vector<8x16xf32> to vector<8x16xbf16>
    %c0_23 = arith.constant 0 : index
    %c16 = arith.constant 16 : index
    %82 = vector.load %arg8[%c0_23, %c16] : memref<8x64xbf16, #tpu.memory_space<vmem>>, vector<8x16xbf16>
    tpu.vector_store %arg8[%c0_23, %c16], %81 {strides = array<i32>} : memref<8x64xbf16, #tpu.memory_space<vmem>>, vector<8x16xbf16>,
    %83 = vector.extract_strided_slice %32 {offsets = [0, 32], sizes = [8, 16], strides = [1, 1]} : vector<8x192xf32> to vector<8x16xf32>
    %84 = vector.shape_cast %83 : vector<8x16xf32> to vector<1x8x16xf32>
    %85 = vector.extract_strided_slice %32 {offsets = [0, 96], sizes = [8, 16], strides = [1, 1]} : vector<8x192xf32> to vector<8x16xf32>
    %86 = vector.shape_cast %85 : vector<8x16xf32> to vector<1x8x16xf32>
    %87 = vector.extract_strided_slice %32 {offsets = [0, 160], sizes = [8, 16], strides = [1, 1]} : vector<8x192xf32> to vector<8x16xf32>
    %88 = vector.shape_cast %87 : vector<8x16xf32> to vector<1x8x16xf32>
    %89 = arith.truncf %84 : vector<1x8x16xf32> to vector<1x8x16xbf16>
    %90 = arith.truncf %86 : vector<1x8x16xf32> to vector<1x8x16xbf16>
    "tpu.trace_start"() <{level = 10 : i32, message = "bqd,bkd->bqk"}> : () -> ()
    %cst_24 = arith.constant dense<0.000000e+00> : vector<1x8x8xf32>
    %91 = tpu.matmul %89, %90, %cst_24 {dimension_numbers = #tpu.dot_dimension_numbers<[2], [2], [1], [1], [0, 0, 0, 1, 1, 1], [0], [0]>} : vector<1x8x16xbf16>, vector<1x8x16xbf16>, vector<1x8x8xf32> -> vector<1x8x8xf32>
    "tpu.trace_stop"() : () -> ()
    %cst_25 = arith.constant dense<0xFF800000> : vector<1x8xf32>
    %92 = vector.multi_reduction <maximumf>, %91, %cst_25 [2] : vector<1x8x8xf32> to vector<1x8xf32>
    %93 = vector.shape_cast %92 : vector<1x8xf32> to vector<1x8x1xf32>
    %94 = vector.broadcast %93 : vector<1x8x1xf32> to vector<1x8x8xf32>
    %95 = arith.subf %91, %94 : vector<1x8x8xf32>
    %96 = math.exp %95 : vector<1x8x8xf32>
    %cst_26 = arith.constant dense<0.000000e+00> : vector<1x8xf32>
    %97 = vector.multi_reduction <add>, %96, %cst_26 [2] : vector<1x8x8xf32> to vector<1x8xf32>
    %98 = vector.shape_cast %97 : vector<1x8xf32> to vector<1x8x1xf32>
    %99 = arith.truncf %96 : vector<1x8x8xf32> to vector<1x8x8xbf16>
    %100 = arith.truncf %88 : vector<1x8x16xf32> to vector<1x8x16xbf16>
    "tpu.trace_start"() <{level = 10 : i32, message = "bqk,bkd->bqd"}> : () -> ()
    %cst_27 = arith.constant dense<0.000000e+00> : vector<1x8x16xf32>
    %101 = tpu.matmul %99, %100, %cst_27 {dimension_numbers = #tpu.dot_dimension_numbers<[2], [1], [1], [2], [0, 0, 0, 1, 1, 2], [0], [0]>} : vector<1x8x8xbf16>, vector<1x8x16xbf16>, vector<1x8x16xf32> -> vector<1x8x16xf32>
    "tpu.trace_stop"() : () -> ()
    %102 = tpu.reciprocal %98 {approx = true} : vector<1x8x1xf32> -> vector<1x8x1xf32>
    %103 = vector.broadcast %102 : vector<1x8x1xf32> to vector<1x8x16xf32>
    %104 = arith.mulf %101, %103 : vector<1x8x16xf32>
    %105 = vector.shape_cast %104 : vector<1x8x16xf32> to vector<8x16xf32>
    %106 = arith.truncf %105 : vector<8x16xf32> to vector<8x16xbf16>
    %c0_28 = arith.constant 0 : index
    %c32 = arith.constant 32 : index
    %107 = vector.load %arg8[%c0_28, %c32] : memref<8x64xbf16, #tpu.memory_space<vmem>>, vector<8x16xbf16>
    tpu.vector_store %arg8[%c0_28, %c32], %106 {strides = array<i32>} : memref<8x64xbf16, #tpu.memory_space<vmem>>, vector<8x16xbf16>,
    %108 = vector.extract_strided_slice %32 {offsets = [0, 48], sizes = [8, 16], strides = [1, 1]} : vector<8x192xf32> to vector<8x16xf32>
    %109 = vector.shape_cast %108 : vector<8x16xf32> to vector<1x8x16xf32>
    %110 = vector.extract_strided_slice %32 {offsets = [0, 112], sizes = [8, 16], strides = [1, 1]} : vector<8x192xf32> to vector<8x16xf32>
    %111 = vector.shape_cast %110 : vector<8x16xf32> to vector<1x8x16xf32>
    %112 = vector.extract_strided_slice %32 {offsets = [0, 176], sizes = [8, 16], strides = [1, 1]} : vector<8x192xf32> to vector<8x16xf32>
    %113 = vector.shape_cast %112 : vector<8x16xf32> to vector<1x8x16xf32>
    %114 = arith.truncf %109 : vector<1x8x16xf32> to vector<1x8x16xbf16>
    %115 = arith.truncf %111 : vector<1x8x16xf32> to vector<1x8x16xbf16>
    "tpu.trace_start"() <{level = 10 : i32, message = "bqd,bkd->bqk"}> : () -> ()
    %cst_29 = arith.constant dense<0.000000e+00> : vector<1x8x8xf32>
    %116 = tpu.matmul %114, %115, %cst_29 {dimension_numbers = #tpu.dot_dimension_numbers<[2], [2], [1], [1], [0, 0, 0, 1, 1, 1], [0], [0]>} : vector<1x8x16xbf16>, vector<1x8x16xbf16>, vector<1x8x8xf32> -> vector<1x8x8xf32>
    "tpu.trace_stop"() : () -> ()
    %cst_30 = arith.constant dense<0xFF800000> : vector<1x8xf32>
    %117 = vector.multi_reduction <maximumf>, %116, %cst_30 [2] : vector<1x8x8xf32> to vector<1x8xf32>
    %118 = vector.shape_cast %117 : vector<1x8xf32> to vector<1x8x1xf32>
    %119 = vector.broadcast %118 : vector<1x8x1xf32> to vector<1x8x8xf32>
    %120 = arith.subf %116, %119 : vector<1x8x8xf32>
    %121 = math.exp %120 : vector<1x8x8xf32>
    %cst_31 = arith.constant dense<0.000000e+00> : vector<1x8xf32>
    %122 = vector.multi_reduction <add>, %121, %cst_31 [2] : vector<1x8x8xf32> to vector<1x8xf32>
    %123 = vector.shape_cast %122 : vector<1x8xf32> to vector<1x8x1xf32>
    %124 = arith.truncf %121 : vector<1x8x8xf32> to vector<1x8x8xbf16>
    %125 = arith.truncf %113 : vector<1x8x16xf32> to vector<1x8x16xbf16>
    "tpu.trace_start"() <{level = 10 : i32, message = "bqk,bkd->bqd"}> : () -> ()
    %cst_32 = arith.constant dense<0.000000e+00> : vector<1x8x16xf32>
    %126 = tpu.matmul %124, %125, %cst_32 {dimension_numbers = #tpu.dot_dimension_numbers<[2], [1], [1], [2], [0, 0, 0, 1, 1, 2], [0], [0]>} : vector<1x8x8xbf16>, vector<1x8x16xbf16>, vector<1x8x16xf32> -> vector<1x8x16xf32>
    "tpu.trace_stop"() : () -> ()
    %127 = tpu.reciprocal %123 {approx = true} : vector<1x8x1xf32> -> vector<1x8x1xf32>
    %128 = vector.broadcast %127 : vector<1x8x1xf32> to vector<1x8x16xf32>
    %129 = arith.mulf %126, %128 : vector<1x8x16xf32>
    %130 = vector.shape_cast %129 : vector<1x8x16xf32> to vector<8x16xf32>
    %131 = arith.truncf %130 : vector<8x16xf32> to vector<8x16xbf16>
    %c0_33 = arith.constant 0 : index
    %c48 = arith.constant 48 : index
    %132 = vector.load %arg8[%c0_33, %c48] : memref<8x64xbf16, #tpu.memory_space<vmem>>, vector<8x16xbf16>
    tpu.vector_store %arg8[%c0_33, %c48], %131 {strides = array<i32>} : memref<8x64xbf16, #tpu.memory_space<vmem>>, vector<8x16xbf16>,
    %c0_34 = arith.constant 0 : index
    %c0_35 = arith.constant 0 : index
    %133 = vector.load %arg8[%c0_34, %c0_35] : memref<8x64xbf16, #tpu.memory_space<vmem>>, vector<8x64xbf16>
    %c0_36 = arith.constant 0 : index
    %c0_37 = arith.constant 0 : index
    %134 = vector.load %arg5[%c0_36, %c0_37] : memref<64x32xbf16, #tpu.memory_space<vmem>>, vector<64x32xbf16>
    %cst_38 = arith.constant dense<0.000000e+00> : vector<8x32xf32>
    %135 = tpu.matmul %133, %134, %cst_38 {dimension_numbers = #tpu.dot_dimension_numbers<[1], [0], [0], [1], [0, 0, 1, 1], [], []>} : vector<8x64xbf16>, vector<64x32xbf16>, vector<8x32xf32> -> vector<8x32xf32>
    %c0_39 = arith.constant 0 : index
    %c0_40 = arith.constant 0 : index
    %136 = vector.load %arg6[%c0_39, %c0_40] : memref<1x32xf32, #tpu.memory_space<vmem>>, vector<1x32xf32>
    %137 = vector.shape_cast %136 : vector<1x32xf32> to vector<32xf32>
    %138 = vector.shape_cast %137 : vector<32xf32> to vector<1x32xf32>
    %139 = vector.broadcast %138 : vector<1x32xf32> to vector<8x32xf32>
    %140 = arith.addf %135, %139 : vector<8x32xf32>
    %141 = vector.shape_cast %140 : vector<8x32xf32> to vector<1x8x32xf32>
    %c0_41 = arith.constant 0 : index
    %c0_42 = arith.constant 0 : index
    %c0_43 = arith.constant 0 : index
    %142 = vector.load %arg7[%c0_41, %c0_42, %c0_43] : memref<1x8x32xf32, #tpu.memory_space<vmem>>, vector<1x8x32xf32>
    tpu.vector_store %arg7[%c0_41, %c0_42, %c0_43], %141 {strides = array<i32>} : memref<1x8x32xf32, #tpu.memory_space<vmem>>, vector<1x8x32xf32>,
    return
  }
  func.func @transform_0(%arg0: i32) -> (i32, i32, i32) {
    %c0_i32 = arith.constant 0 : i32
    %c0_i32_0 = arith.constant 0 : i32
    %c0_i32_1 = arith.constant 0 : i32
    return %arg0, %c0_i32, %c0_i32_0 : i32, i32, i32
  }
  func.func @transform_1(%arg0: i32) -> (i32, i32) {
    %c0_i32 = arith.constant 0 : i32
    %c0_i32_0 = arith.constant 0 : i32
    %c0_i32_1 = arith.constant 0 : i32
    return %c0_i32, %c0_i32_0 : i32, i32
  }
  func.func @transform_2(%arg0: i32) -> (i32, i32) {
    %c0_i32 = arith.constant 0 : i32
    %c0_i32_0 = arith.constant 0 : i32
    %c0_i32_1 = arith.constant 0 : i32
    return %c0_i32, %c0_i32_0 : i32, i32
  }
  func.func @transform_3(%arg0: i32) -> (i32, i32) {
    %c0_i32 = arith.constant 0 : i32
    %c0_i32_0 = arith.constant 0 : i32
    %c0_i32_1 = arith.constant 0 : i32
    return %c0_i32, %c0_i32_0 : i32, i32
  }
  func.func @transform_4(%arg0: i32) -> (i32, i32) {
    %c0_i32 = arith.constant 0 : i32
    %c0_i32_0 = arith.constant 0 : i32
    %c0_i32_1 = arith.constant 0 : i32
    return %c0_i32, %c0_i32_0 : i32, i32
  }
  func.func @transform_5(%arg0: i32) -> (i32, i32) {
    %c0_i32 = arith.constant 0 : i32
    %c0_i32_0 = arith.constant 0 : i32
    %c0_i32_1 = arith.constant 0 : i32
    return %c0_i32, %c0_i32_0 : i32, i32
  }
  func.func @transform_6(%arg0: i32) -> (i32, i32, i32) {
    %c0_i32 = arith.constant 0 : i32
    %c0_i32_0 = arith.constant 0 : i32
    %c0_i32_1 = arith.constant 0 : i32
    return %arg0, %c0_i32, %c0_i32_0 : i32, i32, i32
  }
}

</mosaic_0001>

<bundles_post_ra>
// kernel: tpu_custom_call.1
= control target key start
LH: loop header
LB: loop body
LE: loop exit
PB: predicated region body
PF: predicated region fallthrough
CT: control target
= control target key end

     0   :  { %11 = vsyncpa [#allocation4], 0  ;;  %s1494_s0 = inlined_call_operand.vmem [shape: f32[2,8,32], index: 0, kind: input, shape index: {}]   ;;  %s1495_s1 = inlined_call_operand.vmem [shape: f32[1,32], index: 1, kind: input, shape index: {}]   ;;  %s1496_s2 = inlined_call_operand.vmem [shape: f32[1,32], index: 2, kind: input, shape index: {}]   ;;  %s1497_s3 = inlined_call_operand.vmem [shape: bf16[32,192], index: 3, kind: input, shape index: {}]   ;;  %s1498_s4 = inlined_call_operand.vmem [shape: bf16[64,32], index: 4, kind: input, shape index: {}]   ;;  %s1499_s5 = inlined_call_operand.vmem [shape: f32[1,32], index: 5, kind: input, shape index: {}]   ;;  %s1500_s6 = inlined_call_operand.hbm [shape: f32[2,8,32], index: 6, kind: output, shape index: {}]  }
   0x1   :  { %13 = vsyncpa [#allocation4 + $0x1], 0  ;;  %s1285_s21 = smov 0   ;;  %s1287_s22 = smov 0  }
   0x2   :  { %s1289_s23 = smov 0   ;;  %s1291_s24 = smov 0  }
   0x3 LB: > { %s1306_s25 = sadd.s32 4294967295, %s1237_s24   ;;  %s980_s26 = sadd.s32 4294967294, %s1237_s24   ;;  %s1237_s24 = sphi %s1291_s24, %s1506_s24   ;;  %s1233_s23 = sphi %s1289_s23, %s1505_s23   ;;  %s1229_s22 = sphi %s1287_s22, %s1504_s22   ;;  %s1225_s21 = sphi %s1285_s21, %s1503_s21  }
   0x4   : > { %s1310_s27 = sadd.s32 1, %s1237_s24   ;;  %s157_s28 = sadd.s32 1, %s1233_s23 }
   0x5   : > { %s154_s29 = ssub.s32 %s1237_s24, %s1310_s27  ;;  %p167_p0 = scmp.ne.s32.totalorder %s1233_s23, %s1229_s22 }
   0x6   : > { %p155_p1 = scmp.eq.s32.totalorder %s154_s29, 0  ;;  %p168_p2 = scmp.eq.s32.totalorder %s1306_s25, 1 }
   0x7   : > { %p173_p3 = scmp.ne.s32.totalorder %s1229_s22, %s1225_s21  ;;  %p174_p4 = scmp.eq.s32.totalorder %s980_s26, 1 }
   0x8   : > { %s1321_s30 = scalar_select %p155_p1, %s1233_s23, %s157_s28  }
   0x9   : > { %p1323_p5 = por %p168_p2, %p167_p0  ;;  %p1327_p6 = por %p174_p4, %p173_p3 }
   0xa   : > { %p983_p7 = scmp.ge.s32.totalorder %s1237_s24, 1  ;;  %p214_p8 = scmp.lt.s32.totalorder %s1237_s24, 3 }
   0xc   : > { %p215_p9 = pnand %p983_p7, %p214_p8 }
   0xd   : > { %p243_p10 = scmp.lt.s32.totalorder (!%p215_p9), %s1306_s25, 1  ;;  %vm249_vm0 = vcmask (!%p215_p9), 261120   ;;  %v1147_v7 = vld [vmem:[%s1497_s3 + $0x4] ss:$8 sps:$4 sm:$0xff] (!%p215_p9)   ;;  %v1149_v8 = vld [vmem:[%s1497_s3] ss:$8 sps:$4 sm:$0xff] (!%p215_p9)  }
   0xe   : > { %218 = sbr.rel (%p215_p9) target bundleno = 1678 (0x68e), region = 44  ;;  %v1150_v9 = vld [vmem:[%s1497_s3 + $0x14] ss:$8 sps:$4 sm:$0xff] (!%p215_p9)   ;;  %308 = vmatprep.subr.bf16.mxu0 (!%p215_p9), %v1147_v7  ;;  %v1239_v10 = vmov (!%p215_p9), 0   ;;  %v1152_v11 = vld [vmem:[%s1497_s3 + $0x10] ss:$8 sps:$4 sm:$0xff] (!%p215_p9)  }
   0xf   : > { %340 = vmatprep.mubr.bf16.mxu0 (!%p215_p9), %v1239_v10  ;;  %309 = vmatpush1.bf16.msra.mxu0 (!%p215_p9), %v1149_v8  ;;  %v986_v16 = vld [vmem:[%s1495_s1] ss:$0 sm:$0xff] (!%p215_p9)  ;;  %v1240_v22 = vmov (!%p215_p9), 0.0   ;;  %vm1241_vm1 = vmmov (!%p215_p9), 0   ;;  %vm415_vm2 = vcmask (!%p215_p9), 1043456   ;;  %s1242_s11 = smov (!%p215_p9), 112  }
  0x10   : > { %310 = vmatprep.subr.bf16.mxu0 (!%p215_p9), %v1150_v9  ;;  %v987_v18 = vld [vmem:[%s1496_s2] ss:$0 sm:$0xff] (!%p215_p9)  ;;  %1038 = vmatprep.subr.bf16.mxu1 (!%p215_p9), %v1240_v22  ;;  %s1243_s12 = smov (!%p215_p9), 64   ;;  %s1245_s14 = smov (!%p215_p9), 32   ;;  %vm353_vm3 = vcmask (!%p215_p9), 130048   ;;  %vm400_vm4 = vcmask (!%p215_p9), 64512  }
  0x11   : > { %1040 = vmatprep.mubr.msk.bf16.mxu1 (!%p215_p9), %vm1241_vm1, %v1240_v22  ;;  %s1246_s15 = smov (!%p215_p9), 96   ;;  %s1247_s16 = smov (!%p215_p9), 16   ;;  %vm462_vm5 = vcmask (!%p215_p9), 125952   ;;  %vm582_vm6 = vcmask (!%p215_p9), 257152   ;;  %vm701_vm7 = vcmask (!%p215_p9), 388352   ;;  %vm820_vm8 = vcmask (!%p215_p9), 519552  }
  0x12   : > { %s1248_s17 = smov (!%p215_p9), 80   ;;  %vm862_vm9 = vcmask (!%p215_p9), 523264   ;;  %s1249_s28 = smov (!%p215_p9), [#allocation3]  }
  0x13   : > { %311 = vmatpush1.bf16.msra.mxu0 (!%p215_p9), %v1152_v11  ;;  %s1179_s29 = sshll.u32 (!%p215_p9), %s1249_s28, 4  ;;  %s1180_s29 = int_to_ptr.vmem [resolvable:$false] %s1179_s29 }
  0x14   : > { %1044 = vmatprep.subr.bf16.mxu0 (!%p215_p9), %v1240_v22 }
  0x15   : > { %s244_s9 = scalar_select %p243_p10, %s1306_s25, 1 }
  0x17   : > { %s985_s10 = sshll.u32 %s244_s9, 3  ;;  %s1181_s9 = scalar_lea.vmem %s1180_s29, 256 }
  0x18   : > { %s246_s13 = scalar_lea.vmem %s1494_s0, %s985_s10 }
  0x19   : > { %v248_v0 = vld [vmem:[%s246_s13] sm:$0xff]  ;;  %s1244_s13 = smov 48  }
  0x1a   : > { %v250_v1 = vsel %vm249_vm0, %v248_v0, 0.0 }
  0x1b   : > { %251 = vadd.xlane.f32.xlu0 %v250_v1 }
  0xa8   : > { %v252_v2 = vpop.xlane.xlu0 %251 }
  0xa9   : > { %v254_v3 = vmul.f32 0.03125, %v252_v2 }
  0xab   : > { %v255_v4 = vsub.f32 %v248_v0, %v254_v3 }
  0xad   : > { %v256_v5 = vmul.f32 %v255_v4, %v255_v4 }
  0xaf   : > { %v257_v6 = vsel %vm249_vm0, %v256_v5, 0.0 }
  0xb0   : > { %258 = vadd.xlane.f32.xlu0 %v257_v6 }
 0x13d   : > { %v259_v12 = vpop.xlane.xlu0 %258 }
 0x13e   : > { %v260_v13 = vmul.f32 0.03125, %v259_v12 }
 0x140   : > { %v261_v14 = vadd.f32 1e-05, %v260_v13 }
 0x142   : > { %1157 = vrsqrt.f32 %v261_v14 }
 0x14c   : > { %v1158_v15 = vpop.eup %1157 }
 0x14d   : > { %v263_v17 = vmul.f32 %v1158_v15, %v255_v4 }
 0x14f   : > { %v271_v19 = vmul.f32 %v986_v16, %v263_v17 }
 0x151   : > { %v279_v20 = vadd.f32 %v987_v18, %v271_v19 }
 0x153   : > { %v280_v21 = vpack.c.bf16 %v279_v20, %v279_v20 }
 0x155   : > { %992 = vmatmul.mubr.msk.bf16.vlgmr.msra.gmra.mrb[0].mxu0 %vm249_vm0, %v280_v21 }
 0x156   : > { %1046 = vmatprep.mubr.msk.bf16.mxu0 %vm1241_vm1, %v1240_v22 }
 0x228   : > { %v342_v23 = vpop.f32.mrb[0].mxu0 }
 0x229   : > { %v349_v24 = vpack.c.bf16 %v342_v23, %v342_v23  ;;  %v344_v25 = vpop.f32.mrb[1].mxu0 }
 0x22a   : > { %v1365_v26 = vpack.c.bf16 %v344_v25, %v344_v25  ;;  %v346_v27 = vpop.f32.mrb[2].mxu0 }
 0x22b   : > { %464 = vrot.lane.b32.xlu0 %v349_v24, %s1242_s11  ;;  %351 = vrot.lane.b32.xlu1 %v349_v24, %s1243_s12  ;;  %v347_v28 = vpop.f32.mrb[3].mxu0 }
 0x22c   : > { %v417_v29 = vsel %vm415_vm2, %v1365_v26, 0 }
 0x22d   : > { %1045 = vmatpush3.bf16.msra.mxu0 %v417_v29 }
 0x22e   : > { %1056 = vmatprep.subr.bf16.mxu0 %v1240_v22 }
 0x22f   : > { %466 = vrot.lane.b32.xlu1 %v349_v24, %s1244_s13 }
 0x233   : > { %586 = vrot.lane.b32.xlu1 %v349_v24, %s1245_s14 }
 0x237   : > { %584 = vrot.lane.b32.xlu1 %v349_v24, %s1246_s15 }
 0x23b   : > { %705 = vrot.lane.b32.xlu1 %v349_v24, %s1247_s16 }
 0x23f   : > { %703 = vrot.lane.b32.xlu1 %v349_v24, %s1248_s17 }
 0x29d   : > { %v352_v30 = vpop.permute.xlu1 %351  ;;  %v465_v35 = vpop.permute.xlu0 %464 }
 0x29e   : > { %v358_v31 = vsel %vm353_vm3, %v352_v30, 0 }
 0x29f   : > { %1039 = vmatpush3.bf16.xpose.msra.mxu1 %v358_v31 }
 0x2a0   : > { %1050 = vmatprep.subr.bf16.mxu1 %v1240_v22 }
 0x2a1   : > { %v467_v32 = vpop.permute.xlu1 %466 }
 0x2a2   : > { %v472_v33 = vsel %vm353_vm3, %v467_v32, 0 }
 0x2a5   : > { %v587_v34 = vpop.permute.xlu1 %586 }
 0x2a6   : > { %1041 = vmatmul.mubr.msk.bf16.vlgmr.msra.gmra.mrb[0].mxu1 %vm353_vm3, %v349_v24  ;;  %v592_v37 = vsel %vm353_vm3, %v587_v34, 0 }
 0x2a7   : > { %1051 = vmatpush3.bf16.xpose.msra.mxu1 %v472_v33  ;;  %1052 = vmatprep.mubr.msk.bf16.mxu1 %vm1241_vm1, %v1240_v22 }
 0x2a8   : > { %1062 = vmatprep.subr.bf16.mxu1 %v1240_v22 }
 0x2a9   : > { %v585_v36 = vpop.permute.xlu1 %584 }
 0x2ad   : > { %v706_v38 = vpop.permute.xlu1 %705 }
 0x2ae   : > { %1053 = vmatmul.mubr.msk.bf16.vlgmr.msra.gmra.mrb[4].mxu1 %vm353_vm3, %v465_v35  ;;  %v711_v39 = vsel %vm353_vm3, %v706_v38, 0 }
 0x2af   : > { %1063 = vmatpush3.bf16.xpose.msra.mxu1 %v592_v37  ;;  %1064 = vmatprep.mubr.msk.bf16.mxu1 %vm1241_vm1, %v1240_v22 }
 0x2b0   : > { %1074 = vmatprep.subr.bf16.mxu1 %v1240_v22 }
 0x2b1   : > { %v704_v40 = vpop.permute.xlu1 %703 }
 0x2b6   : > { %1065 = vmatmul.mubr.msk.bf16.vlgmr.msra.gmra.mrb[8].mxu1 %vm353_vm3, %v585_v36 }
 0x2b7   : > { %1075 = vmatpush3.bf16.xpose.msra.mxu1 %v711_v39  ;;  %1076 = vmatprep.mubr.msk.bf16.mxu1 %vm1241_vm1, %v1240_v22 }
 0x2b8   : > { %1086 = vmatprep.subr.bf16.mxu1 %v1240_v22 }
 0x2be   : > { %1077 = vmatmul.mubr.msk.bf16.vlgmr.msra.gmra.mrb[12].mxu1 %vm353_vm3, %v704_v40 }
 0x2bf   : > { %1094 = vmatprep.mubr.msk.bf16.mxu1 %vm1241_vm1, %v1240_v22 }
 0x379   : > { %v394_v41 = vpop.f32.mrb[0].mxu1 }
 0x37a   : > { %v1042_v42 = vpop.f32.mrb[1].mxu1  ;;  %v401_v43 = vsel %vm400_vm4, %v394_v41, -inf }
 0x37b   : > { %402 = vmax.xlane.f32.xlu1 %v401_v43  ;;  %v397_v44 = vpop.f32.mrb[2].mxu1 }
 0x37c   : > { %v1043_v45 = vpop.f32.mrb[3].mxu1 }
 0x37d   : > { %v1153_v45 = vld [vmem:[%s1498_s4] sm:$0xff]  }
 0x37e   : > { %1087 = vmatpush3.bf16.msra.mxu1 %v1153_v45 }
 0x37f   : > { %1088 = vmatprep.subr.bf16.mxu1 %v1240_v22 }
 0x381   : > { %v508_v46 = vpop.f32.mrb[4].mxu1 }
 0x382   : > { %v1054_v47 = vpop.f32.mrb[5].mxu1  ;;  %v514_v48 = vsel %vm400_vm4, %v508_v46, -inf }
 0x383   : > { %515 = vmax.xlane.f32.xlu0 %v514_v48  ;;  %v511_v49 = vpop.f32.mrb[6].mxu1 }
 0x384   : > { %v1055_v50 = vpop.f32.mrb[7].mxu1 }
 0x385   : > { %v1155_v50 = vld [vmem:[%s1498_s4 + $0x10] sm:$0xff]  }
 0x389   : > { %v628_v51 = vpop.f32.mrb[8].mxu1 }
 0x38a   : > { %v1066_v52 = vpop.f32.mrb[9].mxu1  ;;  %v634_v60 = vsel %vm400_vm4, %v628_v51, -inf }
 0x38b   : > { %v631_v53 = vpop.f32.mrb[10].mxu1 }
 0x38c   : > { %v1067_v54 = vpop.f32.mrb[11].mxu1  ;;  %525 = vrot.lane.b32.xlu1 %v1365_v26, %s1242_s11  ;;  %s240_s11 = sand.u32 1, %s1229_s22  }
 0x38d   : > { %v1156_v54 = vld [vmem:[%s1498_s4 + $0x18] sm:$0xff]   ;;  %s984_s12 = sshll.u32 %s240_s11, 3 }
 0x391   : > { %v747_v55 = vpop.f32.mrb[12].mxu1 }
 0x392   : > { %v1078_v56 = vpop.f32.mrb[13].mxu1  ;;  %v753_v57 = vsel %vm400_vm4, %v747_v55, -inf }
 0x393   : > { %754 = vmax.xlane.f32.xlu0 %v753_v57  ;;  %v750_v58 = vpop.f32.mrb[14].mxu1 }
 0x394   : > { %v1079_v59 = vpop.f32.mrb[15].mxu1 }
 0x3a9   : > { %644 = vrot.lane.b32.xlu0 %v1365_v26, %s1246_s15 }
 0x3b0   : > { %635 = vmax.xlane.f32.xlu1 %v634_v60 }
 0x3c1   : > { %763 = vrot.lane.b32.xlu1 %v1365_v26, %s1248_s17 }
 0x408   : > { %v403_v61 = vpop.xlane.xlu1 %402 }
 0x409   : > { %v404_v62 = vsub.f32 %v394_v41, %v403_v61 }
 0x40b   : > { %v405_v63 = vmul.f32 1.442695, %v404_v62 }
 0x40c   : > { %v526_v4 = vpop.permute.xlu1 %525 }
 0x40d   : > { %1159 = vpow2.f32 %v405_v63  ;;  %v531_v6 = vsel %vm415_vm2, %v526_v4, 0 }
 0x410   : > { %v516_v0 = vpop.xlane.xlu0 %515 }
 0x411   : > { %v517_v1 = vsub.f32 %v508_v46, %v516_v0  ;;  %v1154_v46 = vld [vmem:[%s1498_s4 + $0x8] sm:$0xff]  }
 0x412   : > { %1089 = vmatpush3.bf16.msra.mxu1 %v1154_v46 }
 0x413   : > { %v518_v2 = vmul.f32 1.442695, %v517_v1  ;;  %1090 = vmatprep.subr.bf16.mxu1 %v1240_v22 }
 0x415   : > { %1161 = vpow2.f32 %v518_v2 }
 0x416   : > { %1091 = vmatpush3.bf16.msra.mxu1 %v1155_v50 }
 0x417   : > { %v1160_v3 = vpop.eup %1159  ;;  %1092 = vmatprep.subr.bf16.mxu1 %v1240_v22 }
 0x418   : > { %v410_v5 = vpack.c.bf16 %v1160_v3, %v1160_v3  ;;  %v407_v12 = vsel %vm400_vm4, %v1160_v3, 0.0  ;;  %v1004_v3 = vld [vmem:[%s1499_s5] ss:$0 sm:$0xff] }
 0x41a   : > { %1047 = vmatmul.mubr.msk.bf16.vlgmr.msra.gmra.mrb[4].mxu0 %vm400_vm4, %v410_v5  ;;  %1093 = vmatpush3.bf16.msra.mxu1 %v1156_v54 }
 0x41b   : > { %1057 = vmatpush3.bf16.msra.mxu0 %v531_v6  ;;  %1058 = vmatprep.mubr.msk.bf16.mxu0 %vm1241_vm1, %v1240_v22 }
 0x41c   : > { %1068 = vmatprep.subr.bf16.mxu0 %v1240_v22 }
 0x41f   : > { %v1162_v7 = vpop.eup %1161 }
 0x420   : > { %v755_v8 = vpop.xlane.xlu0 %754  ;;  %v520_v9 = vsel %vm400_vm4, %v1162_v7, 0.0  ;;  %v523_v10 = vpack.c.bf16 %v1162_v7, %v1162_v7 }
 0x421   : > { %521 = vadd.xlane.f32.xlu1 %v520_v9  ;;  %v756_v14 = vsub.f32 %v747_v55, %v755_v8 }
 0x422   : > { %1059 = vmatmul.mubr.msk.bf16.vlgmr.msra.gmra.mrb[8].mxu0 %vm400_vm4, %v523_v10 }
 0x423   : > { %1070 = vmatprep.mubr.msk.bf16.mxu0 %vm1241_vm1, %v1240_v22  ;;  %v757_v17 = vmul.f32 1.442695, %v756_v14 }
 0x424   : > { %v645_v11 = vpop.permute.xlu0 %644 }
 0x425   : > { %v650_v13 = vsel %vm415_vm2, %v645_v11, 0  ;;  %408 = vadd.xlane.f32.xlu1 %v407_v12 }
 0x426   : > { %1069 = vmatpush3.bf16.msra.mxu0 %v650_v13 }
 0x427   : > { %1080 = vmatprep.subr.bf16.mxu0 %v1240_v22 }
 0x43d   : > { %v636_v15 = vpop.xlane.xlu1 %635 }
 0x43e   : > { %v637_v16 = vsub.f32 %v628_v51, %v636_v15 }
 0x440   : > { %v638_v18 = vmul.f32 1.442695, %v637_v16 }
 0x441   : > { %v764_v20 = vpop.permute.xlu1 %763 }
 0x442   : > { %1163 = vpow2.f32 %v638_v18  ;;  %v769_v25 = vsel %vm415_vm2, %v764_v20, 0 }
 0x443   : > { %1165 = vpow2.f32 %v757_v17 }
 0x44c   : > { %v1164_v19 = vpop.eup %1163 }
 0x44d   : > { %v640_v21 = vsel %vm400_vm4, %v1164_v19, 0.0  ;;  %v643_v23 = vpack.c.bf16 %v1164_v19, %v1164_v19  ;;  %v1166_v24 = vpop.eup %1165 }
 0x44e   : > { %641 = vadd.xlane.f32.xlu0 %v640_v21  ;;  %v759_v26 = vsel %vm400_vm4, %v1166_v24, 0.0  ;;  %v762_v27 = vpack.c.bf16 %v1166_v24, %v1166_v24 }
 0x44f   : > { %1071 = vmatmul.mubr.msk.bf16.vlgmr.msra.gmra.mrb[12].mxu0 %vm400_vm4, %v643_v23 }
 0x450   : > { %1081 = vmatpush3.bf16.msra.mxu0 %v769_v25  ;;  %1082 = vmatprep.mubr.msk.bf16.mxu0 %vm1241_vm1, %v1240_v22 }
 0x452   : > { %760 = vadd.xlane.f32.xlu0 %v759_v26 }
 0x457   : > { %1083 = vmatmul.mubr.msk.bf16.vlgmr.msra.gmra.mrb[16].mxu0 %vm400_vm4, %v762_v27 }
 0x4ae   : > { %v522_v28 = vpop.xlane.xlu1 %521 }
 0x4b2   : > { %v409_v29 = vpop.xlane.xlu1 %408 }
 0x4b3   : > { %1167 = vrcp.f32 %v409_v29 }
 0x4b4   : > { %1169 = vrcp.f32 %v522_v28 }
 0x4bd   : > { %v1168_v30 = vpop.eup %1167 }
 0x4be   : > { %v1170_v37 = vpop.eup %1169 }
 0x4db   : > { %v642_v44 = vpop.xlane.xlu0 %641 }
 0x4dc   : > { %1171 = vrcp.f32 %v642_v44 }
 0x4df   : > { %v761_v47 = vpop.xlane.xlu0 %760 }
 0x4e0   : > { %1173 = vrcp.f32 %v761_v47 }
 0x4e6   : > { %v1172_v48 = vpop.eup %1171 }
 0x4ea   : > { %v1174_v57 = vpop.eup %1173 }
 0x4ed   : > { %v453_v31 = vpop.f32.mrb[4].mxu0 }
 0x4ee   : > { %v460_v32 = vmul.f32 %v1168_v30, %v453_v31  ;;  %v1048_v33 = vpop.f32.mrb[5].mxu0 }
 0x4ef   : > { %v456_v34 = vpop.f32.mrb[6].mxu0 }
 0x4f0   : > { %v461_v35 = vpack.c.bf16 %v460_v32, %v460_v32  ;;  %v1049_v36 = vpop.f32.mrb[7].mxu0 }
 0x4f2   : > { %463 = vst.msk [vmem:[#allocation2] sm:$0xf] %vm462_vm5, %v461_v35 }
 0x4f5   : > { %v567_v38 = vpop.f32.mrb[8].mxu0 }
 0x4f6   : > { %v574_v39 = vmul.f32 %v1170_v37, %v567_v38  ;;  %v1060_v40 = vpop.f32.mrb[9].mxu0 }
 0x4f7   : > { %v570_v41 = vpop.f32.mrb[10].mxu0 }
 0x4f8   : > { %v1014_v42 = vpack.c.bf16 %v574_v39, %v574_v39  ;;  %v1061_v43 = vpop.f32.mrb[11].mxu0 }
 0x4fa   : > { %579 = vrot.lane.b32.xlu0 %v1014_v42, %s1247_s16  ;;  %s242_s16 = scalar_lea.vmem [#allocation3], %s984_s12 }
 0x4fb   : > { %s921_s17 = sshll.u32 %s242_s16, 4  ;;  %s1453_s17 = int_to_ptr.vmem [resolvable:$true] %s921_s17 }
 0x4fc   : > { %s1175_s26 = scalar_lea.vmem %s1453_s17, 128  ;;  %p1182_p0 = scmp.lt.s32.totalorder %s1453_s17, %s1180_s29 }
 0x4fd   : > { %p1176_p11 = scmp.ne.s32.totalorder %s1453_s17, %s1175_s26  ;;  %p1183_p1 = scmp.lt.s32.totalorder %s1181_s9, %s1175_s26 }
 0x4ff   : > { %p1177_p12 = pnand %p1176_p11, %p1323_p5  ;;  %p1184_p2 = por %p1183_p1, %p1182_p0 }
 0x501   : > { %p1178_p13 = pneg %p1177_p12 }
 0x503   : > { %p1185_p3 = pnand %p1184_p2, %p1178_p13 }
 0x522   : > { %v686_v49 = vpop.f32.mrb[12].mxu0 }
 0x523   : > { %v693_v51 = vmul.f32 %v1172_v48, %v686_v49  ;;  %v1072_v52 = vpop.f32.mrb[13].mxu0 }
 0x524   : > { %v689_v53 = vpop.f32.mrb[14].mxu0 }
 0x525   : > { %v1015_v55 = vpack.c.bf16 %v693_v51, %v693_v51  ;;  %v1073_v56 = vpop.f32.mrb[15].mxu0 }
 0x527   : > { %698 = vrot.lane.b32.xlu1 %v1015_v55, %s1245_s14 }
 0x52a   : > { %v805_v58 = vpop.f32.mrb[16].mxu0 }
 0x52b   : > { %v812_v59 = vmul.f32 %v1174_v57, %v805_v58  ;;  %v1084_v60 = vpop.f32.mrb[17].mxu0 }
 0x52c   : > { %v808_v61 = vpop.f32.mrb[18].mxu0 }
 0x52d   : > { %v1016_v62 = vpack.c.bf16 %v812_v59, %v812_v59  ;;  %v1085_v63 = vpop.f32.mrb[19].mxu0 }
 0x52f   : > { %817 = vrot.lane.b32.xlu1 %v1016_v62, %s1244_s13  ;;  %s1011_s13 = sshll.u32 %s1306_s25, 7  ;;  %s908_s25 = scalar_lea.sflag [#allocation4], %s240_s11 }
 0x530   : > { %s1451_s20 = scalar_lea.hbm %s1500_s6, %s1011_s13 }
 0x56c   : > { %v580_v0 = vpop.permute.xlu0 %579 }
 0x56d   : > { %583 = vst.msk [vmem:[#allocation2] sm:$0xf] %vm582_vm6, %v580_v0 }
 0x599   : > { %v699_v1 = vpop.permute.xlu1 %698 }
 0x59a   : > { %702 = vst.msk [vmem:[#allocation2] sm:$0xf] %vm701_vm7, %v699_v1 }
 0x5a1   : > { %v818_v22 = vpop.permute.xlu1 %817 }
 0x5a2   : > { %821 = vst.msk [vmem:[#allocation2] sm:$0xf] %vm820_vm8, %v818_v22 }
 0x5a9   : > { %v822_v2 = vld [vmem:[#allocation2] sm:$0xf] }
 0x5aa   : > { %1095 = vmatmul.mubr.msk.bf16.vlgmr.msra.gmra.mrb[16].mxu1 %vm862_vm9, %v822_v2 }
 0x67d   : > { %v900_v4 = vpop.f32.mrb[16].mxu1 }
 0x67e   : > { %v901_v5 = vadd.f32 %v1004_v3, %v900_v4  ;;  %v1096_v6 = vpop.f32.mrb[17].mxu1 }
 0x67f   : > { %v903_v7 = vpop.f32.mrb[18].mxu1 }
 0x680   : > { %v1097_v8 = vpop.f32.mrb[19].mxu1  ;;  %906 = vst.msk [vmem:[%s242_s16] sm:$0xff] %vm249_vm0, %v901_v5 }
 0x681   : > { %1188 = shalt.err (!%p1185_p3)
}
 0x682   : > { %s1189_s10 = scalar_lea.hbm %s1451_s20, 128  ;;  %s1193_s14 = scalar_lea.hbm %s1500_s6, 256 }
 0x683   : > { %p1190_p4 = scmp.ne.s32.totalorder %s1451_s20, %s1189_s10  ;;  %p1194_p9 = scmp.lt.u32.totalorder %s1451_s20, %s1500_s6 }
 0x684   : > { %p1195_p10 = scmp.lt.u32.totalorder %s1193_s14, %s1189_s10  ;;  %p1197_p12 = scmp.lt.u32.totalorder %s1189_s10, %s1451_s20 }
 0x685   : > { %p1191_p7 = pnand %p1190_p4, %p1323_p5 }
 0x686   : > { %p1196_p11 = por %p1195_p10, %p1194_p9 }
 0x687   : > { %p1192_p8 = pneg %p1191_p7 }
 0x688   : > { %p1198_p13 = por %p1197_p12, %p1196_p11 }
 0x68a   : > { %p1199_p0 = pnand %p1198_p13, %p1192_p8 }
 0x68c   : > { %1202 = shalt.err (!%p1199_p0)
}
 0x68d   : > { %1098 = dma.vmem_to_hbm [thread:$0]  (%p1323_p5), %s1453_s17, 128, %s1451_s20, %s908_s25  }
 0x68e PF: > { %p1104_p1 = scmp.ge.s32.totalorder %s1237_s24, 2  ;;  %s933_s16 = sand.u32 1, %s1225_s21  }
 0x68f   : > { %s934_s18 = scalar_lea.sflag [#allocation4], %s933_s16 }
 0x690   : > { %p1101_p2 = pnand %p1104_p1, %p1327_p6 }
 0x692   : > { %1220 = dma.done.wait (!%p1101_p2), %s934_s18, 128  }
 0x693   : > { %1222 = vsyncadd (!%p1101_p2), %s934_s18, 4294967168  ;;  %p16_p3 = scmp.ge.s32.totalorder %s1310_s27, 4   ;;  %s1503_s21 = smov %s1229_s22 }
 0x694   : > { %s1504_s22 = smov %s1233_s23  ;;  %s1505_s23 = smov %s1321_s30 }
 0x695   : > { %s1506_s24 = smov %s1310_s27  ;;  %18 = sbr.rel (!%p16_p3) target bundleno = 3 (0x3), region = 79 }
 0x69c   :  { %939 = vsyncpa [#allocation4], 1 }
 0x69d   :  { %941 = vsyncpa [#allocation4 + $0x1], 1 }

</bundles_post_ra>
